<compile_context>
chip_gen: v7x
topology: tpu7x:2x2x1
jax: 0.10.0
libtpu: 0.0.40
codegen_flags: <defaults>
</compile_context>

<pallas_src>
import jax
import jax.numpy as jnp
from jax.experimental import pallas as pl
from jax.experimental.pallas import tpu as pltpu


# ---------------------------------------------------------------------------
# Fused kernel: whole (C, HW) slab for one batch element in VMEM.
# ---------------------------------------------------------------------------
def _scse_fused_kernel(x_ref, w1t_ref, b1_ref, w2t_ref, b2_ref, wsr_ref,
                       bs_ref, o_ref):
    x = x_ref[0]                                              # (C, HW) f32
    hw = x.shape[1]

    # cSE: global average pool over HW (lane reduction) -> (C, 1)
    mean = jnp.sum(x, axis=1, keepdims=True) * (1.0 / hw)     # (C, 1)
    z1 = jnp.dot(w1t_ref[...], mean,
                 preferred_element_type=jnp.float32) + b1_ref[...]   # (h, 1)
    z1 = jnp.maximum(z1, 0.0)
    z2 = jnp.dot(w2t_ref[...], z1,
                 preferred_element_type=jnp.float32) + b2_ref[...]   # (C, 1)
    c_att = jax.nn.sigmoid(z2)                                # (C, 1)

    # sSE: (1, C) @ (C, HW) -> (1, HW), lane-dense result
    s = jnp.dot(wsr_ref[...], x,
                preferred_element_type=jnp.float32) + bs_ref[0]      # (1, HW)
    s_att = jax.nn.sigmoid(s)

    # single multiply: x*c + x*s == x*(c+s)
    o_ref[0] = x * (c_att + s_att)


# ---------------------------------------------------------------------------
# Tiled "apply" kernel: c_att precomputed; tile the HW axis.
# ---------------------------------------------------------------------------
def _scse_apply_kernel(x_ref, c_ref, wsr_ref, bs_ref, o_ref):
    x = x_ref[0]                                              # (C, T)
    s = jnp.dot(wsr_ref[...], x,
                preferred_element_type=jnp.float32) + bs_ref[0]      # (1, T)
    s_att = jax.nn.sigmoid(s)
    o_ref[0] = x * (c_ref[0] + s_att)                         # (C,1)+(1,T) bcast


def _pick_hw_tile(hw, target=2048):
    """Largest multiple of 128 dividing hw and <= target; else full hw."""
    if hw % 128 != 0:
        return hw
    best, t = 128, 128
    while t <= min(hw, target):
        if hw % t == 0:
            best = t
        t += 128
    return best


def scse_pallas(x_nchw, w1, b1, w2, b2, ws, bs, *,
                fused_vmem_slab_bytes=4 * 1024 * 1024,
                hw_tile_target=2048):
    """x_nchw: (N, C, H, W) float32. Weights in matmul layout:
       w1: (C, h), b1: (1, h), w2: (h, C), b2: (1, C), ws: (C, 1), bs: (1, 1)."""
    N, C, H, W = x_nchw.shape
    HW = H * W
    h = w1.shape[1]

    # Free reshape: NCHW -> (N, C, HW).  HW on the 128-lane axis.
    x = x_nchw.reshape(N, C, HW)

    wsr = ws.reshape(1, C)          # sSE weight as a row vector
    bs1 = bs.reshape(1)             # sSE bias as an SMEM scalar

    slab_bytes = C * HW * x.dtype.itemsize

    if slab_bytes <= fused_vmem_slab_bytes:
        # ------------------ fused per-batch path (2 HBM passes) -------------
        w1t = jnp.transpose(w1)         # (h, C)
        b1c = b1.reshape(h, 1)          # (h, 1)
        w2t = jnp.transpose(w2)         # (C, h)
        b2c = b2.reshape(C, 1)          # (C, 1)
        out = pl.pallas_call(
            _scse_fused_kernel,
            out_shape=jax.ShapeDtypeStruct((N, C, HW), x.dtype),
            grid_spec=pltpu.PrefetchScalarGridSpec(
                num_scalar_prefetch=0,
                grid=(N,),
                in_specs=[
                    pl.BlockSpec((1, C, HW), lambda n: (n, 0, 0)),   # x
                    pl.BlockSpec((h, C), lambda n: (0, 0)),          # w1^T
                    pl.BlockSpec((h, 1), lambda n: (0, 0)),          # b1
                    pl.BlockSpec((C, h), lambda n: (0, 0)),          # w2^T
                    pl.BlockSpec((C, 1), lambda n: (0, 0)),          # b2
                    pl.BlockSpec((1, C), lambda n: (0, 0)),          # ws row
                    pl.BlockSpec(memory_space=pltpu.MemorySpace.SMEM),  # bs
                ],
                out_specs=pl.BlockSpec((1, C, HW), lambda n: (n, 0, 0)),
            ),
            compiler_params=pltpu.CompilerParams(
                dimension_semantics=("parallel",)),
        )(x, w1t, b1c, w2t, b2c, wsr, bs1)
    else:
        # ------------------ tiled path (cSE split out) ----------------------
        # Pooled channel attention in plain JAX: negligible FLOPs (C x h),
        # enables free HW tiling of the bandwidth-bound apply kernel.
        mean = jnp.mean(x, axis=2)                            # (N, C)
        z1 = jnp.maximum(mean @ w1 + b1, 0.0)                 # (N, h)
        c_att = jax.nn.sigmoid(z1 @ w2 + b2)[:, :, None]      # (N, C, 1)

        T = _pick_hw_tile(HW, hw_tile_target)
        out = pl.pallas_call(
            _scse_apply_kernel,
            out_shape=jax.ShapeDtypeStruct((N, C, HW), x.dtype),
            grid_spec=pltpu.PrefetchScalarGridSpec(
                num_scalar_prefetch=0,
                grid=(N, HW // T),
                in_specs=[
                    pl.BlockSpec((1, C, T), lambda n, t: (n, 0, t)),   # x tile
                    pl.BlockSpec((1, C, 1), lambda n, t: (n, 0, 0)),   # c_att
                    pl.BlockSpec((1, C), lambda n, t: (0, 0)),         # ws row
                    pl.BlockSpec(memory_space=pltpu.MemorySpace.SMEM), # bs
                ],
                out_specs=pl.BlockSpec((1, C, T), lambda n, t: (n, 0, t)),
            ),
            compiler_params=pltpu.CompilerParams(
                dimension_semantics=("parallel", "parallel")),
        )(x, c_att, wsr, bs1)

    # Free reshape back to NCHW.
    return out.reshape(N, C, H, W)


def scse_reference(x_nchw, w1, b1, w2, b2, ws, bs):
    """Pure-JAX reference matching the PyTorch forward."""
    mean = jnp.mean(x_nchw, axis=(2, 3))                       # (N, C)
    z1 = jnp.maximum(mean @ w1 + b1, 0.0)                      # (N, h)
    c_att = jax.nn.sigmoid(z1 @ w2 + b2)[:, :, None, None]     # (N, C, 1, 1)
    s = jnp.einsum("nchw,co->nohw", x_nchw, ws) + bs[0, 0]     # (N, 1, H, W)
    s_att = jax.nn.sigmoid(s)
    return x_nchw * c_att + x_nchw * s_att


if __name__ == "__main__":
    key = jax.random.PRNGKey(0)
    N, C, H, W = 2, 32, 16, 16
    reduction = 16
    hidden = C // reduction  # 2

    ks = jax.random.split(key, 7)
    x = jax.random.normal(ks[0], (N, C, H, W), dtype=jnp.float32)

    # PyTorch conv1x1 weights (out,in,1,1) stored directly in matmul layout.
    w1 = jax.random.normal(ks[1], (C, hidden), dtype=jnp.float32) * 0.1
    b1 = jax.random.normal(ks[2], (1, hidden), dtype=jnp.float32) * 0.1
    w2 = jax.random.normal(ks[3], (hidden, C), dtype=jnp.float32) * 0.1
    b2 = jax.random.normal(ks[4], (1, C), dtype=jnp.float32) * 0.1
    ws = jax.random.normal(ks[5], (C, 1), dtype=jnp.float32) * 0.1
    bs = jax.random.normal(ks[6], (1, 1), dtype=jnp.float32) * 0.1

    ref = scse_reference(x, w1, b1, w2, b2, ws, bs)

    # Fused per-batch path (small slab).
    out_fused = jax.block_until_ready(scse_pallas(x, w1, b1, w2, b2, ws, bs))
    assert out_fused.shape == (N, C, H, W)
    assert jnp.allclose(out_fused, ref, atol=1e-5, rtol=1e-5), "fused mismatch"

    # Tiled path (cSE split out, HW tiled) -- forced to exercise tiling.
    out_tiled = jax.block_until_ready(
        scse_pallas(x, w1, b1, w2, b2, ws, bs,
                    fused_vmem_slab_bytes=0, hw_tile_target=128))
    assert jnp.allclose(out_tiled, ref, atol=1e-5, rtol=1e-5), "tiled mismatch"

    print("KERNEL_OK")
</pallas_src>

<mosaic_0001>
module attributes {stable_mosaic.version = 11 : i64} {
  func.func @_scse_fused_kernel(%arg0: i32, %arg1: memref<1x32x256xf32, #tpu.memory_space<vmem>>, %arg2: memref<2x32xf32, #tpu.memory_space<vmem>>, %arg3: memref<2x1xf32, #tpu.memory_space<vmem>>, %arg4: memref<32x2xf32, #tpu.memory_space<vmem>>, %arg5: memref<32x1xf32, #tpu.memory_space<vmem>>, %arg6: memref<1x32xf32, #tpu.memory_space<vmem>>, %arg7: memref<1xf32, #tpu.memory_space<smem>>, %arg8: memref<1x32x256xf32, #tpu.memory_space<vmem>>) attributes {dimension_semantics = [#tpu.dimension_semantics<parallel>], iteration_bounds = array<i64: 2>, scalar_prefetch = 0 : i64, scratch_operands = 0 : i64, tpu.core_type = #tpu.core_type<tc>, window_params = [{transform_indices = @transform_0, window_bounds = array<i64: 1, 32, 256>}, {pipeline_mode = #tpu.pipeline_mode<synchronous>, transform_indices = @transform_1, window_bounds = array<i64: 2, 32>}, {pipeline_mode = #tpu.pipeline_mode<synchronous>, transform_indices = @transform_2, window_bounds = array<i64: 2, 1>}, {pipeline_mode = #tpu.pipeline_mode<synchronous>, transform_indices = @transform_3, window_bounds = array<i64: 32, 2>}, {pipeline_mode = #tpu.pipeline_mode<synchronous>, transform_indices = @transform_4, window_bounds = array<i64: 32, 1>}, {pipeline_mode = #tpu.pipeline_mode<synchronous>, transform_indices = @transform_5, window_bounds = array<i64: 1, 32>}, {transform_indices = @transform_6, window_bounds = array<i64: 1>}, {transform_indices = @transform_7, window_bounds = array<i64: 1, 32, 256>}]} {
    %c0 = arith.constant 0 : index
    %c0_0 = arith.constant 0 : index
    %c0_1 = arith.constant 0 : index
    %0 = vector.load %arg1[%c0, %c0_0, %c0_1] : memref<1x32x256xf32, #tpu.memory_space<vmem>>, vector<1x32x256xf32>
    %1 = vector.shape_cast %0 : vector<1x32x256xf32> to vector<32x256xf32>
    %cst = arith.constant dense<0.000000e+00> : vector<32xf32>
    %2 = vector.multi_reduction <add>, %1, %cst [1] : vector<32x256xf32> to vector<32xf32>
    %3 = vector.shape_cast %2 : vector<32xf32> to vector<32x1xf32>
    %cst_2 = arith.constant 3.906250e-03 : f32
    %4 = vector.broadcast %cst_2 : f32 to vector<32x1xf32>
    %5 = arith.mulf %3, %4 : vector<32x1xf32>
    %c0_3 = arith.constant 0 : index
    %c0_4 = arith.constant 0 : index
    %6 = vector.load %arg2[%c0_3, %c0_4] : memref<2x32xf32, #tpu.memory_space<vmem>>, vector<2x32xf32>
    %cst_5 = arith.constant dense<0.000000e+00> : vector<2x1xf32>
    %7 = tpu.matmul %6, %5, %cst_5 {dimension_numbers = #tpu.dot_dimension_numbers<[1], [0], [0], [1], [0, 0, 1, 1], [], []>} : vector<2x32xf32>, vector<32x1xf32>, vector<2x1xf32> -> vector<2x1xf32>
    %c0_6 = arith.constant 0 : index
    %c0_7 = arith.constant 0 : index
    %8 = vector.load %arg3[%c0_6, %c0_7] : memref<2x1xf32, #tpu.memory_space<vmem>>, vector<2x1xf32>
    %9 = arith.addf %7, %8 : vector<2x1xf32>
    %cst_8 = arith.constant 0.000000e+00 : f32
    %10 = vector.broadcast %cst_8 : f32 to vector<2x1xf32>
    %11 = arith.maximumf %9, %10 : vector<2x1xf32>
    %c0_9 = arith.constant 0 : index
    %c0_10 = arith.constant 0 : index
    %12 = vector.load %arg4[%c0_9, %c0_10] : memref<32x2xf32, #tpu.memory_space<vmem>>, vector<32x2xf32>
    %cst_11 = arith.constant dense<0.000000e+00> : vector<32x1xf32>
    %13 = tpu.matmul %12, %11, %cst_11 {dimension_numbers = #tpu.dot_dimension_numbers<[1], [0], [0], [1], [0, 0, 1, 1], [], []>} : vector<32x2xf32>, vector<2x1xf32>, vector<32x1xf32> -> vector<32x1xf32>
    %c0_12 = arith.constant 0 : index
    %c0_13 = arith.constant 0 : index
    %14 = vector.load %arg5[%c0_12, %c0_13] : memref<32x1xf32, #tpu.memory_space<vmem>>, vector<32x1xf32>
    %15 = arith.addf %13, %14 : vector<32x1xf32>
    %16 = arith.negf %15 : vector<32x1xf32>
    %17 = math.exp %16 : vector<32x1xf32>
    %cst_14 = arith.constant 1.000000e+00 : f32
    %18 = vector.broadcast %cst_14 : f32 to vector<32x1xf32>
    %19 = arith.addf %18, %17 : vector<32x1xf32>
    %20 = arith.divf %18, %19 : vector<32x1xf32>
    %c0_15 = arith.constant 0 : index
    %c0_16 = arith.constant 0 : index
    %21 = vector.load %arg6[%c0_15, %c0_16] : memref<1x32xf32, #tpu.memory_space<vmem>>, vector<1x32xf32>
    %cst_17 = arith.constant dense<0.000000e+00> : vector<1x256xf32>
    %22 = tpu.matmul %21, %1, %cst_17 {dimension_numbers = #tpu.dot_dimension_numbers<[1], [0], [0], [1], [0, 0, 1, 1], [], []>} : vector<1x32xf32>, vector<32x256xf32>, vector<1x256xf32> -> vector<1x256xf32>
    %c0_18 = arith.constant 0 : index
    %23 = memref.load %arg7[%c0_18] : memref<1xf32, #tpu.memory_space<smem>>
    %24 = vector.broadcast %23 : f32 to vector<1x256xf32>
    %25 = arith.addf %22, %24 : vector<1x256xf32>
    %26 = arith.negf %25 : vector<1x256xf32>
    %27 = math.exp %26 : vector<1x256xf32>
    %cst_19 = arith.constant 1.000000e+00 : f32
    %28 = vector.broadcast %cst_19 : f32 to vector<1x256xf32>
    %29 = arith.addf %28, %27 : vector<1x256xf32>
    %30 = arith.divf %28, %29 : vector<1x256xf32>
    %31 = vector.broadcast %20 : vector<32x1xf32> to vector<32x256xf32>
    %32 = vector.broadcast %30 : vector<1x256xf32> to vector<32x256xf32>
    %33 = arith.addf %31, %32 : vector<32x256xf32>
    %34 = arith.mulf %1, %33 : vector<32x256xf32>
    %c0_20 = arith.constant 0 : index
    %c0_21 = arith.constant 0 : index
    %c0_22 = arith.constant 0 : index
    %35 = vector.load %arg8[%c0_20, %c0_21, %c0_22] : memref<1x32x256xf32, #tpu.memory_space<vmem>>, vector<1x32x256xf32>
    %36 = vector.shape_cast %35 : vector<1x32x256xf32> to vector<32x256xf32>
    %37 = vector.shape_cast %34 : vector<32x256xf32> to vector<1x32x256xf32>
    tpu.vector_store %arg8[%c0_20, %c0_21, %c0_22], %37 {strides = array<i32>} : memref<1x32x256xf32, #tpu.memory_space<vmem>>, vector<1x32x256xf32>,
    return
  }
  func.func @transform_0(%arg0: i32) -> (i32, i32, i32) {
    %c0_i32 = arith.constant 0 : i32
    %c0_i32_0 = arith.constant 0 : i32
    %c0_i32_1 = arith.constant 0 : i32
    return %arg0, %c0_i32, %c0_i32_0 : i32, i32, i32
  }
  func.func @transform_1(%arg0: i32) -> (i32, i32) {
    %c0_i32 = arith.constant 0 : i32
    %c0_i32_0 = arith.constant 0 : i32
    %c0_i32_1 = arith.constant 0 : i32
    return %c0_i32, %c0_i32_0 : i32, i32
  }
  func.func @transform_2(%arg0: i32) -> (i32, i32) {
    %c0_i32 = arith.constant 0 : i32
    %c0_i32_0 = arith.constant 0 : i32
    %c0_i32_1 = arith.constant 0 : i32
    return %c0_i32, %c0_i32_0 : i32, i32
  }
  func.func @transform_3(%arg0: i32) -> (i32, i32) {
    %c0_i32 = arith.constant 0 : i32
    %c0_i32_0 = arith.constant 0 : i32
    %c0_i32_1 = arith.constant 0 : i32
    return %c0_i32, %c0_i32_0 : i32, i32
  }
  func.func @transform_4(%arg0: i32) -> (i32, i32) {
    %c0_i32 = arith.constant 0 : i32
    %c0_i32_0 = arith.constant 0 : i32
    %c0_i32_1 = arith.constant 0 : i32
    return %c0_i32, %c0_i32_0 : i32, i32
  }
  func.func @transform_5(%arg0: i32) -> (i32, i32) {
    %c0_i32 = arith.constant 0 : i32
    %c0_i32_0 = arith.constant 0 : i32
    %c0_i32_1 = arith.constant 0 : i32
    return %c0_i32, %c0_i32_0 : i32, i32
  }
  func.func @transform_6(%arg0: i32) -> i32 {
    %c0_i32 = arith.constant 0 : i32
    %c0_i32_0 = arith.constant 0 : i32
    return %c0_i32 : i32
  }
  func.func @transform_7(%arg0: i32) -> (i32, i32, i32) {
    %c0_i32 = arith.constant 0 : i32
    %c0_i32_0 = arith.constant 0 : i32
    %c0_i32_1 = arith.constant 0 : i32
    return %arg0, %c0_i32, %c0_i32_0 : i32, i32, i32
  }
}

</mosaic_0001>

<bundles_post_ra>
// kernel: tpu_custom_call.1
= control target key start
LH: loop header
LB: loop body
LE: loop exit
PB: predicated region body
PF: predicated region fallthrough
CT: control target
= control target key end

     0   :  { %s1309_s0 = inlined_call_operand.hbm [shape: f32[2,32,256], index: 0, kind: input, shape index: {}]   ;;  %s1310_s1 = inlined_call_operand.vmem [shape: f32[2,32], index: 1, kind: input, shape index: {}]   ;;  %s1311_s2 = inlined_call_operand.vmem [shape: f32[2,1], index: 2, kind: input, shape index: {}]   ;;  %s1312_s3 = inlined_call_operand.vmem [shape: f32[32,2], index: 3, kind: input, shape index: {}]   ;;  %s1313_s4 = inlined_call_operand.vmem [shape: f32[32,1], index: 4, kind: input, shape index: {}]   ;;  %s1314_s5 = inlined_call_operand.vmem [shape: f32[1,32], index: 5, kind: input, shape index: {}]   ;;  %s1315_s6 = inlined_call_operand.<no memory space> [shape: f32[1], index: 6, kind: input, shape index: {}]   ;;  %s1316_s7 = inlined_call_operand.hbm [shape: f32[2,32,256], index: 7, kind: output, shape index: {}]  }
   0x1   :  { %12 = sst [smem:[#allocation2]] %s1315_s6 }
   0x2   :  { %13 = vsyncpa [#allocation4], 0 }
   0x3   :  { %15 = vsyncpa [#allocation4 + $0x1], 0 }
   0x4   :  { %16 = vsyncpa [#allocation5], 0 }
   0x5   :  { %18 = vsyncpa [#allocation5 + $0x1], 0  ;;  %s1064_s26 = smov 0   ;;  %s1066_s27 = smov 0  }
   0x6   :  { %s1068_s28 = smov 0   ;;  %s1070_s29 = smov 0  }
   0x7 LB: > { %s1085_s6 = sadd.s32 4294967295, %s1009_s29   ;;  %s761_s30 = sadd.s32 4294967294, %s1009_s29   ;;  %s1009_s29 = sphi %s1070_s29, %s1329_s29   ;;  %s1005_s28 = sphi %s1068_s28, %s1328_s28   ;;  %s1001_s27 = sphi %s1066_s27, %s1327_s27   ;;  %s997_s26 = sphi %s1064_s26, %s1326_s26  }
   0x8   : > { %s1089_s8 = sadd.s32 1, %s1009_s29   ;;  %s31_s9 = sadd.s32 1, %s1005_s28 }
   0x9   : > { %s28_s10 = ssub.s32 %s1009_s29, %s1089_s8  ;;  %p38_p0 = scmp.ne.s32.totalorder %s1005_s28, %s1001_s27 }
   0xa   : > { %p29_p1 = scmp.eq.s32.totalorder %s28_s10, 0  ;;  %p39_p2 = scmp.eq.s32.totalorder %s1009_s29, 0 }
   0xb   : > { %p44_p3 = scmp.ne.s32.totalorder %s1001_s27, %s997_s26  ;;  %p45_p4 = scmp.eq.s32.totalorder %s1085_s6, 0 }
   0xc   : > { %s1101_s11 = scalar_select %p29_p1, %s1005_s28, %s31_s9  }
   0xd   : > { %p1103_p5 = por %p39_p2, %p38_p0  ;;  %p1107_p6 = por %p45_p4, %p44_p3 }
   0xe   : > { %p194_p7 = scmp.eq.s32.totalorder %s1085_s6, 1  ;;  %p200_p8 = scmp.eq.s32.totalorder %s761_s30, 1 }
   0xf   : > { %p845_p10 = scmp.lt.s32.totalorder %s1009_s29, 2  ;;  %s238_s16 = sand.u32 1, %s1005_s28  }
  0x10   : > { %p1114_p11 = por %p194_p7, %p38_p0  ;;  %p1118_p12 = por %p200_p8, %p44_p3 }
  0x11   : > { %s788_s17 = sshll.u32 %s1009_s29, 10  ;;  %s764_s18 = sshll.u32 %s238_s16, 6 }
  0x12   : > { %s1320_s14 = scalar_select %p1114_p11, 1, 0 }
  0x13   : > { %s1321_s15 = scalar_select %p1118_p12, 1, 0 }
  0x14   : > { %s1127_s21 = scalar_lea.hbm %s1309_s0, %s788_s17  ;;  %s242_s22 = scalar_lea.vmem [#allocation3], %s764_s18 }
  0x15   : > { %s249_s23 = sshll.u32 %s242_s22, 4  ;;  %p1131_p13 = pnand %p845_p10, %p1103_p5  ;;  %s1135_s23 = int_to_ptr.vmem [resolvable:$true] %s249_s23 }
  0x16   : > { %s1137_s25 = scalar_lea.sflag [#allocation4], %s238_s16  ;;  %s913_s30 = scalar_lea.hbm %s1127_s21, 1024 }
  0x17   : > { %p914_p0 = scmp.ne.s32.totalorder %s1127_s21, %s913_s30  ;;  %p915_p1 = pneg %p1131_p13 }
  0x18   : > { %s918_s12 = scalar_lea.hbm %s1309_s0, 2048  ;;  %p919_p4 = scmp.lt.u32.totalorder %s1127_s21, %s1309_s0 }
  0x19   : > { %p916_p2 = pnand %p915_p1, %p914_p0  ;;  %p920_p5 = scmp.lt.u32.totalorder %s918_s12, %s913_s30 }
  0x1a   : > { %p922_p8 = scmp.lt.u32.totalorder %s913_s30, %s1127_s21 }
  0x1b   : > { %p917_p3 = pneg %p916_p2  ;;  %p921_p7 = por %p920_p5, %p919_p4 }
  0x1d   : > { %p923_p10 = por %p922_p8, %p921_p7 }
  0x1f   : > { %p924_p9 = pnand %p923_p10, %p917_p3 }
  0x21   : > { %927 = shalt.err (!%p924_p9)
}
  0x22   : > { %s928_s16 = scalar_lea.vmem %s1135_s23, 1024  ;;  %s1011_s19 = smov [#allocation3]  }
  0x23   : > { %p929_p0 = scmp.ne.s32.totalorder %s1135_s23, %s928_s16  ;;  %s933_s20 = sshll.u32 %s1011_s19, 4  ;;  %s934_s20 = int_to_ptr.vmem [resolvable:$false] %s933_s20 }
  0x24   : > { %s935_s22 = scalar_lea.vmem %s934_s20, 2048  ;;  %p936_p11 = scmp.lt.s32.totalorder %s1135_s23, %s934_s20 }
  0x25   : > { %p931_p2 = pnand %p929_p0, %p915_p1  ;;  %p937_p4 = scmp.lt.s32.totalorder %s935_s22, %s928_s16 }
  0x27   : > { %p932_p12 = pneg %p931_p2  ;;  %p938_p5 = por %p937_p4, %p936_p11 }
  0x29   : > { %p939_p7 = pnand %p938_p5, %p932_p12 }
  0x2b   : > { %942 = shalt.err (!%p939_p7)
}
  0x2c   : > { %s1012_s30 = smov 256   ;;  %s1013_s9 = smov 16  }
  0x2d   : > { %840 = dma.hbm_to_vmem [thread:$0]  (!%p1131_p13), %s1127_s21, 1024, %s1135_s23, %s1137_s25, %s1012_s30, %s1012_s30, %s1013_s9  }
  0x2e   : > { %p767_p9 = scmp.ge.s32.totalorder %s1009_s29, 1  ;;  %p257_p1 = scmp.lt.s32.totalorder %s1009_s29, 3 }
  0x30   : > { %p258_p3 = pnand %p767_p9, %p257_p1 }
  0x31   : > { %s1168_s10 = sand.u32 (!%p258_p3), 1, %s1001_s27  }
  0x32   : > { %261 = sbr.rel (%p258_p3) target bundleno = 833 (0x341), region = 48  ;;  %s768_s12 = sshll.u32 (!%p258_p3), %s1168_s10, 6 }
  0x33   : > { %s264_s17 = scalar_lea.sflag (!%p258_p3), [#allocation4], %s1168_s10  ;;  %s267_s18 = scalar_lea.vmem (!%p258_p3), [#allocation3], %s768_s12 }
  0x39   : > { %988 = dma.done.wait (%p1107_p6), %s264_s17, 1024  }
  0x3a   : > { %990 = vsyncadd (%p1107_p6), %s264_s17, 4294966272  ;;  %v1178_v0 = vld [vmem:[%s267_s18 + $0x20] sm:$0xff]  ;;  %v1180_v1 = vld [vmem:[%s267_s18 + $0x28] sm:$0xff]  ;;  %v1014_v12 = vmov 0.0|0.0   ;;  %vm1015_vm0 = vmmov 0   ;;  %v1016_v13 = vmov 0.0  }
  0x3b   : > { %v1182_v2 = vld [vmem:[%s267_s18] sm:$0xff]  ;;  %v312_v3 = vadd.f32 %v1180_v1, %v1178_v0  ;;  %v1186_v4 = vld [vmem:[%s267_s18 + $0x8] sm:$0xff]  ;;  %v1188_v5 = vld [vmem:[%s267_s18 + $0x30] sm:$0xff]  ;;  %819 = vmatprep.subr.bf16.mxu0 %v1014_v12  ;;  %808 = vmatprep.mubr.msk.f32.mxu0 %vm1015_vm0, %v1016_v13  ;;  %vm324_vm1 = vcmask 261120   ;;  %vm407_vm2 = vcmask 15360   ;;  %vm420_vm3 = vcmask 1041408  }
  0x3c   : > { %v1190_v6 = vld [vmem:[%s267_s18 + $0x38] sm:$0xff]  ;;  %v306_v7 = vadd.f32 %v1186_v4, %v1182_v2  ;;  %v1194_v8 = vld [vmem:[%s267_s18 + $0x10] sm:$0xff]  ;;  %v322_v24 = vld [vmem:[%s1310_s1] sm:$0x3]  ;;  %v831_v36 = vpack.c.bf16 %v1188_v5, %v1178_v0  ;;  %v1017_v39 = vmov 0   ;;  %s534_s30 = sld [smem:[#allocation2]] }
  0x3d   : > { %v1196_v9 = vld [vmem:[%s267_s18 + $0x18] sm:$0xff]  ;;  %313 = vadd.xlane.f32.xlu1 %v312_v3  ;;  %v315_v10 = vadd.f32 %v1190_v6, %v1188_v5  ;;  %v399_v25 = vld [vmem:[%s1312_s3] sm:$0xff]  ;;  %v827_v32 = vpack.c.bf16 %v1194_v8, %v1182_v2  ;;  %v400_v33 = vld [vmem:[%s1312_s3 + $0x8] sm:$0xff]  ;;  %v829_v35 = vpack.c.bf16 %v1190_v6, %v1180_v1  ;;  %887 = vset.pattern.permute.xlu0 %v1017_v39  ;;  %s297_s9 = scalar_lea.vmem [#allocation6], %s768_s12  ;;  %s789_s17 = sshll.u32 %s1085_s6, 10 }
  0x3e   : > { %307 = vadd.xlane.f32.xlu0 %v306_v7  ;;  %v309_v11 = vadd.f32 %v1196_v9, %v1194_v8  ;;  %813 = vmatprep.mubr.msk.f32.mxu1 %vm407_vm2, %v399_v25  ;;  %v323_v26 = vld [vmem:[%s1311_s2] sm:$0x3]  ;;  %v825_v31 = vpack.c.bf16 %v1196_v9, %v1186_v4  ;;  %v401_v34 = vld [vmem:[%s1312_s3 + $0x10] sm:$0xff]  ;;  %v402_v37 = vld [vmem:[%s1312_s3 + $0x18] sm:$0xff]  ;;  %s688_s18 = sshll.u32 %s297_s9, 4  ;;  %s1261_s21 = scalar_lea.hbm %s1316_s7, %s789_s17  ;;  %s1263_s18 = int_to_ptr.vmem [resolvable:$true] %s688_s18 }
  0x3f   : > { %v533_v38 = vld [vmem:[%s1314_s5] sm:$0x1]  ;;  %888 = vset.pattern.permute.xlu1 %v1017_v39  ;;  %v404_v40 = vld [vmem:[%s1313_s4 + $0x8] sm:$0xff]  ;;  %v406_v46 = vld [vmem:[%s1313_s4 + $0x18] sm:$0xff]  ;;  %s675_s6 = scalar_lea.sflag [#allocation5], %s1168_s10  ;;  %s943_s23 = scalar_lea.vmem %s1263_s18, 1024 }
  0x40   : > { %v403_v41 = vld [vmem:[%s1313_s4] sm:$0xff]  ;;  %v405_v48 = vld [vmem:[%s1313_s4 + $0x10] sm:$0xff]  ;;  %p944_p6 = scmp.ne.s32.totalorder %s1263_s18, %s943_s23  ;;  %p1323_p11 = scmp.ne.s32.totalorder %s1320_s14, 0 }
  0x41   : > { %316 = vadd.xlane.f32.xlu1 %v315_v10  ;;  %s1018_s24 = smov [#allocation6]  }
  0x42   : > { %310 = vadd.xlane.f32.xlu0 %v309_v11  ;;  %p945_p12 = pnand %p944_p6, %p1323_p11  ;;  %s947_s25 = sshll.u32 %s1018_s24, 4  ;;  %s948_s25 = int_to_ptr.vmem [resolvable:$false] %s947_s25 }
  0x43   : > { %s949_s16 = scalar_lea.vmem %s948_s25, 2048  ;;  %p950_p8 = scmp.lt.s32.totalorder %s1263_s18, %s948_s25 }
  0x44   : > { %p946_p13 = pneg %p945_p12  ;;  %p951_p10 = scmp.lt.s32.totalorder %s949_s16, %s943_s23 }
  0x46   : > { %p952_p0 = por %p951_p10, %p950_p8 }
  0x48   : > { %p953_p2 = pnand %p952_p0, %p946_p13 }
  0xca   : > { %v314_v14 = vpop.xlane.xlu1 %313 }
  0xcb   : > { %v308_v15 = vpop.xlane.xlu0 %307  ;;  %v320_v20 = vmul.f32 0.00390625, %v314_v14  ;;  %v535_v14 = vstv %s534_s30 }
  0xcc   : > { %v318_v18 = vmul.f32 0.00390625, %v308_v15 }
  0xce   : > { %v317_v16 = vpop.xlane.xlu1 %316 }
  0xcf   : > { %v311_v17 = vpop.xlane.xlu0 %310  ;;  %v321_v21 = vmul.f32 0.00390625, %v317_v16 }
  0xd0   : > { %v319_v19 = vmul.f32 0.00390625, %v311_v17 }
  0xd1   : > { %v823_v23 = vpack.c.bf16 %v321_v21, %v320_v20 }
  0xd2   : > { %v820_v22 = vpack.c.bf16 %v319_v19, %v318_v18 }
  0xd4   : > { %821 = vmatpush3.bf16.msra.mxu0 %v820_v22 }
  0xd5   : > { %822 = vmatprep.subr.bf16.mxu0 %v1014_v12 }
  0xd8   : > { %824 = vmatpush3.bf16.msra.mxu0 %v823_v23  ;;  %v642_v23 = vlaneseq }
  0xdb   : > { %809 = vmatmul.mubr.msk.f32.vlgmr.msra.gmra.mrb[0].mxu0 %vm324_vm1, %v322_v24  ;;  %v643_v24 = vshrl.u32 %v642_v23, 7 }
 0x1ae   : > { %v394_v27 = vpop.f32.mrb[0].mxu0 }
 0x1af   : > { %v395_v28 = vadd.f32 %v394_v27, %v323_v26  ;;  %v810_v29 = vpop.f32.mrb[1].mxu0  ;;  %v644_v26 = vsub.s32 0, %v643_v24 }
 0x1b1   : > { %v398_v30 = vmax.f32 %v395_v28, 0.0 }
 0x1b3   : > { %811 = vmatprep.subr.msk.mxu1 %vm420_vm3, %v398_v30 }
 0x1b4   : > { %812 = vmatpush3.msk.msra.mxu1 %vm420_vm3, %v398_v30 }
 0x1b5   : > { %814 = vmatmul.mubr.msk.f32.vlgmr.msra.gmra.mrb[0].mxu1 %vm407_vm2, %v400_v33  ;;  %826 = vmatprep.subr.bf16.mxu1 %v825_v31 }
 0x1b6   : > { %816 = vmatprep.mubr.msk.f32.mxu1 %vm407_vm2, %v401_v34  ;;  %828 = vmatpush1.bf16.msra.mxu1 %v827_v32 }
 0x1b7   : > { %830 = vmatprep.subr.bf16.mxu1 %v829_v35 }
 0x1b9   : > { %817 = vmatmul.mubr.msk.f32.gmra.mrb[2].mxu1 %vm407_vm2, %v402_v37 }
 0x1ba   : > { %832 = vmatpush1.bf16.msra.mxu1 %v831_v36  ;;  %603 = vmatprep.mubr.f32.mxu1 %v1016_v13 }
 0x1bd   : > { %780 = vmatmul.mubr.msk.f32.vlgmr.msra.gmra.mrb[4].mxu1 %vm324_vm1, %v533_v38 }
 0x288   : > { %v815_v42 = vpop.f32.mrb[0].mxu1 }
 0x289   : > { %v496_v43 = vadd.f32 %v815_v42, %v404_v40  ;;  %v490_v44 = vpop.f32.mrb[1].mxu1 }
 0x28a   : > { %v491_v45 = vadd.f32 %v490_v44, %v403_v41 }
 0x28b   : > { %v777_v47 = vmul.f32 -1.442695, %v496_v43 }
 0x28c   : > { %v776_v49 = vmul.f32 -1.442695, %v491_v45  ;;  %v818_v50 = vpop.f32.mrb[2].mxu1 }
 0x28d   : > { %889 = vpow2.f32 %v777_v47  ;;  %v506_v51 = vadd.f32 %v818_v50, %v406_v46  ;;  %v500_v52 = vpop.f32.mrb[3].mxu1 }
 0x28e   : > { %891 = vpow2.f32 %v776_v49  ;;  %v501_v53 = vadd.f32 %v500_v52, %v405_v48 }
 0x28f   : > { %v779_v54 = vmul.f32 -1.442695, %v506_v51 }
 0x290   : > { %v778_v55 = vmul.f32 -1.442695, %v501_v53  ;;  %v605_v56 = vpop.f32.mrb[4].mxu1 }
 0x291   : > { %893 = vpow2.f32 %v779_v54  ;;  %v607_v57 = vpop.f32.mrb[5].mxu1  ;;  %v606_v15 = vadd.f32 %v605_v56, %v535_v14 }
 0x292   : > { %895 = vpow2.f32 %v778_v55  ;;  %v608_v16 = vadd.f32 %v607_v57, %v535_v14 }
 0x293   : > { %v781_v17 = vmul.f32 -1.442695, %v606_v15 }
 0x294   : > { %v782_v18 = vmul.f32 -1.442695, %v608_v16 }
 0x297   : > { %v890_v58 = vpop.eup %889 }
 0x298   : > { %v892_v59 = vpop.eup %891  ;;  %v522_v60 = vadd.f32 1.0, %v890_v58 }
 0x299   : > { %v521_v61 = vadd.f32 1.0, %v892_v59 }
 0x29a   : > { %897 = vrcp.f32 %v522_v60 }
 0x29b   : > { %v894_v62 = vpop.eup %893  ;;  %899 = vrcp.f32 %v521_v61 }
 0x29c   : > { %v896_v63 = vpop.eup %895  ;;  %v524_v7 = vadd.f32 1.0, %v894_v62 }
 0x29d   : > { %v523_v3 = vadd.f32 1.0, %v896_v63 }
 0x29f   : > { %901 = vrcp.f32 %v523_v3 }
 0x2a0   : > { %903 = vrcp.f32 %v524_v7 }
 0x2a1   : > { %905 = vpow2.f32 %v781_v17 }
 0x2a2   : > { %907 = vpow2.f32 %v782_v18 }
 0x2a4   : > { %v898_v10 = vpop.eup %897 }
 0x2a5   : > { %v900_v11 = vpop.eup %899  ;;  %629 = vperm.xlu1 %888, %v898_v10  }
 0x2a6   : > { %624 = vperm.xlu0 %887, %v900_v11  }
 0x2a9   : > { %v902_v12 = vpop.eup %901 }
 0x2aa   : > { %634 = vperm.xlu1 %888, %v902_v12   ;;  %v904_v13 = vpop.eup %903 }
 0x2ab   : > { %v906_v19 = vpop.eup %905 }
 0x2ac   : > { %v908_v20 = vpop.eup %907  ;;  %v616_v21 = vadd.f32 1.0, %v906_v19 }
 0x2ad   : > { %v617_v22 = vadd.f32 1.0, %v908_v20 }
 0x2ae   : > { %639 = vperm.xlu1 %888, %v904_v13   ;;  %909 = vrcp.f32 %v616_v21 }
 0x2af   : > { %911 = vrcp.f32 %v617_v22 }
 0x2b8   : > { %v910_v25 = vpop.eup %909 }
 0x2b9   : > { %v912_v27 = vpop.eup %911  ;;  %v645_v28 = vrot.slane %v910_v25, %v644_v26 }
 0x2ba   : > { %v649_v29 = vrot.slane %v912_v27, %v644_v26 }
 0x324   : > { %v630_v30 = vpop.permute.xlu1 %629 }
 0x325   : > { %v652_v31 = vadd.f32 %v645_v28, %v630_v30  ;;  %v653_v32 = vadd.f32 %v649_v29, %v630_v30  ;;  %v625_v33 = vpop.permute.xlu0 %624 }
 0x326   : > { %v650_v34 = vadd.f32 %v645_v28, %v625_v33  ;;  %v651_v35 = vadd.f32 %v649_v29, %v625_v33 }
 0x327   : > { %v660_v36 = vmul.f32 %v652_v31, %v1194_v8  ;;  %v661_v37 = vmul.f32 %v653_v32, %v1196_v9 }
 0x328   : > { %v658_v38 = vmul.f32 %v650_v34, %v1182_v2  ;;  %v659_v39 = vmul.f32 %v651_v35, %v1186_v4 }
 0x329   : > { %668 = vst [vmem:[%s297_s9 + $0x10] sm:$0xff] %v660_v36  ;;  %669 = vst [vmem:[%s297_s9 + $0x18] sm:$0xff] %v661_v37  ;;  %v635_v40 = vpop.permute.xlu1 %634 }
 0x32a   : > { %666 = vst [vmem:[%s297_s9] sm:$0xff] %v658_v38  ;;  %667 = vst [vmem:[%s297_s9 + $0x8] sm:$0xff] %v659_v39  ;;  %v654_v41 = vadd.f32 %v645_v28, %v635_v40  ;;  %v655_v42 = vadd.f32 %v649_v29, %v635_v40 }
 0x32c   : > { %v662_v43 = vmul.f32 %v654_v41, %v1178_v0  ;;  %v663_v8 = vmul.f32 %v655_v42, %v1180_v1 }
 0x32d   : > { %v640_v2 = vpop.permute.xlu1 %639 }
 0x32e   : > { %670 = vst [vmem:[%s297_s9 + $0x20] sm:$0xff] %v662_v43  ;;  %671 = vst [vmem:[%s297_s9 + $0x28] sm:$0xff] %v663_v8  ;;  %v656_v4 = vadd.f32 %v645_v28, %v640_v2  ;;  %v657_v9 = vadd.f32 %v649_v29, %v640_v2 }
 0x330   : > { %v664_v0 = vmul.f32 %v656_v4, %v1188_v5  ;;  %v665_v1 = vmul.f32 %v657_v9, %v1190_v6 }
 0x332   : > { %672 = vst [vmem:[%s297_s9 + $0x30] sm:$0xff] %v664_v0  ;;  %673 = vst [vmem:[%s297_s9 + $0x38] sm:$0xff] %v665_v1 }
 0x333   : > { %956 = shalt.err (!%p953_p2)
}
 0x334   : > { %s957_s19 = scalar_lea.hbm %s1261_s21, 1024  ;;  %s961_s30 = scalar_lea.hbm %s1316_s7, 2048 }
 0x335   : > { %p958_p4 = scmp.ne.s32.totalorder %s1261_s21, %s957_s19  ;;  %p962_p9 = scmp.lt.u32.totalorder %s1261_s21, %s1316_s7 }
 0x336   : > { %p963_p1 = scmp.lt.u32.totalorder %s961_s30, %s957_s19  ;;  %p965_p6 = scmp.lt.u32.totalorder %s957_s19, %s1261_s21 }
 0x337   : > { %p959_p5 = pnand %p958_p4, %p1323_p11 }
 0x338   : > { %p964_p3 = por %p963_p1, %p962_p9 }
 0x339   : > { %p960_p7 = pneg %p959_p5 }
 0x33a   : > { %p966_p12 = por %p965_p6, %p964_p3 }
 0x33c   : > { %p967_p13 = pnand %p966_p12, %p960_p7 }
 0x33e   : > { %970 = shalt.err (!%p967_p13)
}
 0x33f   : > { %s1019_s12 = smov 256   ;;  %s1020_s13 = smov 16  }
 0x340   : > { %835 = dma.vmem_to_hbm [thread:$0]  (%p1323_p11), %s1263_s18, 1024, %s1261_s21, %s675_s6, %s1019_s12, %s1019_s12, %s1020_s13  }
 0x341 PF: > { %s703_s23 = sand.u32 1, %s997_s26   ;;  %p1324_p8 = scmp.ne.s32.totalorder %s1321_s15, 0 }
 0x342   : > { %p1325_p10 = scmp.ge.s32.totalorder %s1009_s29, 2  ;;  %s704_s24 = scalar_lea.sflag [#allocation5], %s703_s23 }
 0x344   : > { %p842_p0 = pnand %p1325_p10, %p1324_p8 }
 0x346   : > { %992 = dma.done.wait (!%p842_p0), %s704_s24, 1024  }
 0x347   : > { %994 = vsyncadd (!%p842_p0), %s704_s24, 4294966272  ;;  %p21_p2 = scmp.ge.s32.totalorder %s1089_s8, 4   ;;  %s1326_s26 = smov %s1001_s27 }
 0x348   : > { %s1327_s27 = smov %s1005_s28  ;;  %s1328_s28 = smov %s1101_s11 }
 0x349   : > { %s1329_s29 = smov %s1089_s8  ;;  %23 = sbr.rel (!%p21_p2) target bundleno = 7 (0x7), region = 93 }
 0x350   :  { %709 = vsyncpa [#allocation4], 1 }
 0x351   :  { %711 = vsyncpa [#allocation4 + $0x1], 1 }
 0x352   :  { %712 = vsyncpa [#allocation5], 1 }
 0x353   :  { %714 = vsyncpa [#allocation5 + $0x1], 1 }

</bundles_post_ra>
